<compile_context>
chip_gen: v6e
topology: v6e:2x2x1
jax: 0.10.0
libtpu: 0.0.40
codegen_flags: <defaults>
</compile_context>

<pallas_src>
import functools

import jax
import jax.numpy as jnp
from jax import lax
from jax.experimental import pallas as pl
from jax.experimental.pallas import tpu as pltpu

HIDDEN = (30, 20, 15)
INPUT_SIZE = 38
NUM_CLASSES = 10
BN_EPS = 1e-5

_SIZES = (INPUT_SIZE,) + HIDDEN + (NUM_CLASSES,)   # (38, 30, 20, 15, 10)
_LANES = 128                                       # lane width of packed slab

# Batches up to this size run the single-invocation fused kernel (whole batch
# resident in VMEM); larger batches take the gridded, pipelined path.
_FUSED_MAX_BATCH = 4096
_DEFAULT_BLOCK_ROWS = 2048
_VMEM_LIMIT = 32 * 1024 * 1024      # safe on v5e/v6e (128 MiB) and v7x (64 MiB)


def _align8(r):
    return ((r + 7) // 8) * 8


def _build_layout():
    """Static row layout of the packed [rows, 128] f32 parameter slab.

    Every region starts on an 8-row (sublane) boundary so in-kernel ref slices
    are aligned loads.  Linear biases b1..b3 are NOT packed: a bias immediately
    followed by BatchNorm is exactly cancelled by the batch-mean subtraction,
    so the kernels never read them.
    """
    rows = {}
    r = 0
    for i in range(1, 5):
        fan_in = _SIZES[i - 1]
        rows[f"w{i}"] = r                  # fan_in rows, cols [0, fan_out)
        r = _align8(r + fan_in)
        if i < 4:
            rows[f"gamma{i}"] = r
            r += 8
            rows[f"beta{i}"] = r
            r += 8
        else:
            rows["b4"] = r
            r += 8
    return rows, _align8(r)


_ROWS, _SLAB_ROWS = _build_layout()        # 168 rows -> 84 KiB slab


# ---------------------------------------------------------------------------
# Shared in-kernel parameter views (ref slices; 8-aligned starts, zero cost).
# ---------------------------------------------------------------------------
def _weight_view(p_ref, i):
    fan_in, fan_out = _SIZES[i - 1], _SIZES[i]
    r = _ROWS[f"w{i}"]
    return p_ref[r:r + fan_in, :fan_out]            # [in, out]


def _row_view(p_ref, name, n):
    r = _ROWS[name]
    return p_ref[r:r + 1, :n]                       # [1, n] broadcast row


# ---------------------------------------------------------------------------
# Small-batch path: whole forward pass in one kernel invocation.
# ---------------------------------------------------------------------------
def _mlp_fused_kernel(x_ref, p_ref, o_ref):
    """4 matmuls + 3 fused (single-pass BN affine + ReLU) stages."""
    inv_n = 1.0 / x_ref.shape[0]
    h = x_ref[...]
    for i in (1, 2, 3):
        n = _SIZES[i]
        # fc_i (bias dropped: exactly cancelled by the BN mean subtraction).
        h = jnp.dot(h, _weight_view(p_ref, i),
                    preferred_element_type=jnp.float32)
        # One pass over h for both stats; rsqrt rides the EUP slot.
        mean = jnp.sum(h, axis=0, keepdims=True) * inv_n
        msq = jnp.sum(h * h, axis=0, keepdims=True) * inv_n
        var = jnp.maximum(msq - mean * mean, 0.0)
        scale = _row_view(p_ref, f"gamma{i}", n) * lax.rsqrt(var + BN_EPS)
        shift = _row_view(p_ref, f"beta{i}", n) - mean * scale
        h = jnp.maximum(h * scale + shift, 0.0)
    o_ref[...] = (jnp.dot(h, _weight_view(p_ref, 4),
                          preferred_element_type=jnp.float32)
                  + _row_view(p_ref, "b4", NUM_CLASSES))


def _forward_fused(x, packed):
    batch = x.shape[0]
    vmem = pl.BlockSpec(memory_space=pltpu.MemorySpace.VMEM)
    return pl.pallas_call(
        _mlp_fused_kernel,
        out_shape=jax.ShapeDtypeStruct((batch, NUM_CLASSES), jnp.float32),
        in_specs=[vmem, vmem],
        out_specs=vmem,
        compiler_params=pltpu.CompilerParams(vmem_limit_bytes=_VMEM_LIMIT),
    )(x, packed)


# ---------------------------------------------------------------------------
# Large-batch path: batch grid, auto-pipelined DMA, per-block partial BN stats.
# ---------------------------------------------------------------------------
def _stage_first_kernel(x_ref, p_ref, h_ref, st_ref):
    """fc1 on one batch block + this block's partial BN1 stats (sum, sumsq).

    Zero-padded tail rows of x produce exactly-zero rows of h (no bias is
    added), so they contribute nothing to the stats -- no masking needed here.
    """
    h = jnp.dot(x_ref[...], _weight_view(p_ref, 1),
                preferred_element_type=jnp.float32)
    h_ref[...] = h
    s = jnp.sum(h, axis=0, keepdims=True)
    sq = jnp.sum(h * h, axis=0, keepdims=True)
    st_ref[0] = jnp.concatenate([s, sq], axis=0)


def _stage_mid_kernel(hp_ref, aff_ref, p_ref, h_ref, st_ref, *, layer,
                      valid_rows):
    """BN_{layer-1} affine + ReLU, fc_{layer}, partial BN_{layer} stats."""
    a = jnp.maximum(hp_ref[...] * aff_ref[0:1, :] + aff_ref[1:2, :], 0.0)
    if valid_rows is not None:
        # Zero the padded tail rows so they stay zero downstream and do not
        # contaminate the next layer's batch statistics.
        tb = hp_ref.shape[0]
        gidx = (pl.program_id(0) * tb
                + lax.broadcasted_iota(jnp.int32, (tb, 1), 0))
        a = jnp.where(gidx < valid_rows, a, 0.0)
    h = jnp.dot(a, _weight_view(p_ref, layer),
                preferred_element_type=jnp.float32)
    h_ref[...] = h
    s = jnp.sum(h, axis=0, keepdims=True)
    sq = jnp.sum(h * h, axis=0, keepdims=True)
    st_ref[0] = jnp.concatenate([s, sq], axis=0)


def _stage_last_kernel(hp_ref, aff_ref, p_ref, o_ref):
    """BN3 affine + ReLU, fc4 (+ bias).  Padded tail rows are sliced off by
    the wrapper, so no masking is needed here."""
    a = jnp.maximum(hp_ref[...] * aff_ref[0:1, :] + aff_ref[1:2, :], 0.0)
    # NOTE: the 10-wide output block is a masked (lane-sparse) store; padding
    # to 128 lanes would make it unmasked but write 12.8x the HBM bytes, so
    # the natural width is kept.
    o_ref[...] = (jnp.dot(a, _weight_view(p_ref, 4),
                          preferred_element_type=jnp.float32)
                  + _row_view(p_ref, "b4", NUM_CLASSES))


def _affine_from_stats(partial_stats, gamma, beta, n_valid):
    """Combine per-block (sum, sumsq) partials into the BN affine (scale, shift)."""
    stats = jnp.sum(partial_stats, axis=0)                  # [2, n]
    mean = stats[0] / n_valid
    var = jnp.maximum(stats[1] / n_valid - mean * mean, 0.0)
    scale = gamma * lax.rsqrt(var + BN_EPS)
    shift = beta - mean * scale
    return jnp.stack([scale, shift], axis=0)                # [2, n]


def _forward_gridded(x, packed, *, block_rows=_DEFAULT_BLOCK_ROWS):
    """Large-batch path: 4 gridded pallas_calls with double-buffered DMA.

    Per-block partial BN stats keep every grid step independent, so the batch
    axis is "parallel" (sharded across v7x's 2 TensorCores); the tiny
    cross-block stat combine happens wrapper-side between calls.
    """
    batch = x.shape[0]
    nb = pl.cdiv(batch, block_rows)
    tb = _align8(pl.cdiv(batch, nb))         # balanced tiles, minimal padding
    padded = nb * tb
    valid_rows = None if padded == batch else batch
    if padded != batch:
        x = jnp.pad(x, ((0, padded - batch), (0, 0)))

    cparams = pltpu.CompilerParams(
        dimension_semantics=("parallel",),
        vmem_limit_bytes=_VMEM_LIMIT)
    slab_spec = pl.BlockSpec((_SLAB_ROWS, _LANES), lambda j: (0, 0))

    def block_spec(width):
        return pl.BlockSpec((tb, width), lambda j: (j, 0))

    def stats_out(width):
        return (pl.BlockSpec((1, 2, width), lambda j: (j, 0, 0)),
                jax.ShapeDtypeStruct((nb, 2, width), jnp.float32))

    def gamma_beta(i, n):
        return packed[_ROWS[f"gamma{i}"], :n], packed[_ROWS[f"beta{i}"], :n]

    # Stage 1: fc1 + partial BN1 stats.
    st_spec, st_shape = stats_out(HIDDEN[0])
    h, st = pl.pallas_call(
        _stage_first_kernel,
        grid=(nb,),
        in_specs=[block_spec(INPUT_SIZE), slab_spec],
        out_specs=(block_spec(HIDDEN[0]), st_spec),
        out_shape=(jax.ShapeDtypeStruct((padded, HIDDEN[0]), jnp.float32),
                   st_shape),
        compiler_params=cparams,
    )(x, packed)

    # Stages 2 & 3: BN_{i-1} + ReLU + fc_i + partial BN_i stats.
    n_prev = HIDDEN[0]
    for layer in (2, 3):
        n_out = _SIZES[layer]
        gamma, beta = gamma_beta(layer - 1, n_prev)
        aff = _affine_from_stats(st, gamma, beta, batch)
        st_spec, st_shape = stats_out(n_out)
        h, st = pl.pallas_call(
            functools.partial(_stage_mid_kernel, layer=layer,
                              valid_rows=valid_rows),
            grid=(nb,),
            in_specs=[block_spec(n_prev),
                      pl.BlockSpec((2, n_prev), lambda j: (0, 0)),
                      slab_spec],
            out_specs=(block_spec(n_out), st_spec),
            out_shape=(jax.ShapeDtypeStruct((padded, n_out), jnp.float32),
                       st_shape),
            compiler_params=cparams,
        )(h, aff, packed)
        n_prev = n_out

    # Stage 4: BN3 + ReLU + fc4.
    gamma, beta = gamma_beta(3, n_prev)
    aff = _affine_from_stats(st, gamma, beta, batch)
    out = pl.pallas_call(
        _stage_last_kernel,
        grid=(nb,),
        in_specs=[block_spec(n_prev),
                  pl.BlockSpec((2, n_prev), lambda j: (0, 0)),
                  slab_spec],
        out_specs=block_spec(NUM_CLASSES),
        out_shape=jax.ShapeDtypeStruct((padded, NUM_CLASSES), jnp.float32),
        compiler_params=cparams,
    )(h, aff, packed)
    return out[:batch]


# ---------------------------------------------------------------------------
# Public API
# ---------------------------------------------------------------------------
def pack_params(params):
    """One-time layout bake: transpose Linear weights to [in, out] and pack
    every parameter into one contiguous [_SLAB_ROWS, 128] f32 slab with
    8-aligned row starts.  b1..b3 are intentionally not packed (BN cancels
    them exactly)."""
    slab = jnp.zeros((_SLAB_ROWS, _LANES), jnp.float32)
    for i in range(1, 5):
        w = jnp.asarray(params[f"w{i}"], jnp.float32)     # PyTorch [out, in]
        fan_out, fan_in = w.shape
        r = _ROWS[f"w{i}"]
        slab = slab.at[r:r + fan_in, :fan_out].set(w.T)
        if i < 4:
            slab = slab.at[_ROWS[f"gamma{i}"], :fan_out].set(params[f"gamma{i}"])
            slab = slab.at[_ROWS[f"beta{i}"], :fan_out].set(params[f"beta{i}"])
        else:
            slab = slab.at[_ROWS["b4"], :fan_out].set(params["b4"])
    return slab


def neural_net_forward(x, packed_params, *, block_rows=_DEFAULT_BLOCK_ROWS):
    """x: [batch, INPUT_SIZE] f32.  packed_params: [_SLAB_ROWS, 128] f32 slab."""
    # TODO(synk): optionally accept bf16 x / bf16 weight slab on v6e/v7x
    # (MXU-native, halves HBM traffic); kept f32 for fidelity to the PyTorch
    # module's f32 numerics.
    if x.shape[0] <= _FUSED_MAX_BATCH:
        return _forward_fused(x, packed_params)
    return _forward_gridded(x, packed_params, block_rows=block_rows)


# ---------------------------------------------------------------------------
# Reference + test harness
# ---------------------------------------------------------------------------
def init_params(key):
    """Deterministic synthetic parameters matching the nn.Module shapes."""
    sizes = list(_SIZES)
    params = {}
    keys = jax.random.split(key, 8)
    for i in range(4):
        fan_in, fan_out = sizes[i], sizes[i + 1]
        bound = 1.0 / jnp.sqrt(fan_in)
        params[f"w{i + 1}"] = jax.random.uniform(
            keys[2 * i], (fan_out, fan_in), jnp.float32, -bound, bound)
        params[f"b{i + 1}"] = jax.random.uniform(
            keys[2 * i + 1], (fan_out,), jnp.float32, -bound, bound)
    for i, h in enumerate(HIDDEN):
        params[f"gamma{i + 1}"] = jnp.ones((h,), jnp.float32)
        params[f"beta{i + 1}"] = jnp.zeros((h,), jnp.float32)
    return params


def reference_forward(x, params):
    """Pure-JAX reference (mirrors the PyTorch training-mode forward)."""
    def bn_relu(h, gamma, beta):
        mean = jnp.mean(h, axis=0, keepdims=True)
        var = jnp.mean((h - mean) ** 2, axis=0, keepdims=True)
        return jnp.maximum((h - mean) / jnp.sqrt(var + BN_EPS) * gamma + beta,
                           0.0)

    h = x @ params["w1"].T + params["b1"]
    h = bn_relu(h, params["gamma1"], params["beta1"])
    h = h @ params["w2"].T + params["b2"]
    h = bn_relu(h, params["gamma2"], params["beta2"])
    h = h @ params["w3"].T + params["b3"]
    h = bn_relu(h, params["gamma3"], params["beta3"])
    return h @ params["w4"].T + params["b4"]


if __name__ == "__main__":
    key = jax.random.PRNGKey(0)
    k_x, k_p, k_x2 = jax.random.split(key, 3)

    params = init_params(k_p)
    packed = jax.block_until_ready(pack_params(params))   # one-time bake

    # Small-batch fused path (primary test shape).
    x = jax.random.normal(k_x, (8, INPUT_SIZE), jnp.float32)
    out = jax.block_until_ready(neural_net_forward(x, packed))
    ref = reference_forward(x, params)
    assert out.shape == (8, NUM_CLASSES)
    assert jnp.allclose(out, ref, atol=2e-4, rtol=2e-4), "fused path mismatch"

    # Gridded large-batch path, exercised at reduced size (3 blocks of 104
    # rows with a zero-padded, masked tail) to validate pipelining + masking.
    x2 = jax.random.normal(k_x2, (300, INPUT_SIZE), jnp.float32)
    out2 = jax.block_until_ready(_forward_gridded(x2, packed, block_rows=128))
    ref2 = reference_forward(x2, params)
    assert out2.shape == (300, NUM_CLASSES)
    assert jnp.allclose(out2, ref2, atol=2e-4, rtol=2e-4), "gridded path mismatch"

    print("KERNEL_OK")
</pallas_src>

<mosaic_0001>
module attributes {stable_mosaic.version = 11 : i64} {
  func.func @_mlp_fused_kernel(%arg0: memref<8x38xf32, #tpu.memory_space<vmem>>, %arg1: memref<168x128xf32, #tpu.memory_space<vmem>>, %arg2: memref<8x10xf32, #tpu.memory_space<vmem>>) attributes {dimension_semantics = [], scalar_prefetch = 0 : i64, scratch_operands = 0 : i64, tpu.core_type = #tpu.core_type<tc>} {
    %c0 = arith.constant 0 : index
    %c0_0 = arith.constant 0 : index
    %0 = vector.load %arg0[%c0, %c0_0] : memref<8x38xf32, #tpu.memory_space<vmem>>, vector<8x38xf32>
    %c0_1 = arith.constant 0 : index
    %c0_2 = arith.constant 0 : index
    %1 = vector.load %arg1[%c0_1, %c0_2] : memref<168x128xf32, #tpu.memory_space<vmem>>, vector<38x30xf32>
    %cst = arith.constant dense<0.000000e+00> : vector<8x30xf32>
    %2 = tpu.matmul %0, %1, %cst {dimension_numbers = #tpu.dot_dimension_numbers<[1], [0], [0], [1], [0, 0, 1, 1], [], []>} : vector<8x38xf32>, vector<38x30xf32>, vector<8x30xf32> -> vector<8x30xf32>
    %cst_3 = arith.constant dense<0.000000e+00> : vector<30xf32>
    %3 = vector.multi_reduction <add>, %2, %cst_3 [0] : vector<8x30xf32> to vector<30xf32>
    %4 = vector.shape_cast %3 : vector<30xf32> to vector<1x30xf32>
    %cst_4 = arith.constant 1.250000e-01 : f32
    %5 = vector.broadcast %cst_4 : f32 to vector<1x30xf32>
    %6 = arith.mulf %4, %5 : vector<1x30xf32>
    %7 = arith.mulf %2, %2 : vector<8x30xf32>
    %cst_5 = arith.constant dense<0.000000e+00> : vector<30xf32>
    %8 = vector.multi_reduction <add>, %7, %cst_5 [0] : vector<8x30xf32> to vector<30xf32>
    %9 = vector.shape_cast %8 : vector<30xf32> to vector<1x30xf32>
    %cst_6 = arith.constant 1.250000e-01 : f32
    %10 = vector.broadcast %cst_6 : f32 to vector<1x30xf32>
    %11 = arith.mulf %9, %10 : vector<1x30xf32>
    %12 = arith.mulf %6, %6 : vector<1x30xf32>
    %13 = arith.subf %11, %12 : vector<1x30xf32>
    %cst_7 = arith.constant 0.000000e+00 : f32
    %14 = vector.broadcast %cst_7 : f32 to vector<1x30xf32>
    %15 = arith.maximumf %13, %14 : vector<1x30xf32>
    %c40 = arith.constant 40 : index
    %c0_8 = arith.constant 0 : index
    %16 = vector.load %arg1[%c40, %c0_8] : memref<168x128xf32, #tpu.memory_space<vmem>>, vector<1x30xf32>
    %cst_9 = arith.constant 9.99999974E-6 : f32
    %17 = vector.broadcast %cst_9 : f32 to vector<1x30xf32>
    %18 = arith.addf %15, %17 : vector<1x30xf32>
    %19 = math.rsqrt %18 : vector<1x30xf32>
    %20 = arith.mulf %16, %19 : vector<1x30xf32>
    %c48 = arith.constant 48 : index
    %c0_10 = arith.constant 0 : index
    %21 = vector.load %arg1[%c48, %c0_10] : memref<168x128xf32, #tpu.memory_space<vmem>>, vector<1x30xf32>
    %22 = arith.mulf %6, %20 : vector<1x30xf32>
    %23 = arith.subf %21, %22 : vector<1x30xf32>
    %24 = vector.broadcast %20 : vector<1x30xf32> to vector<8x30xf32>
    %25 = arith.mulf %2, %24 : vector<8x30xf32>
    %26 = vector.broadcast %23 : vector<1x30xf32> to vector<8x30xf32>
    %27 = arith.addf %25, %26 : vector<8x30xf32>
    %cst_11 = arith.constant 0.000000e+00 : f32
    %28 = vector.broadcast %cst_11 : f32 to vector<8x30xf32>
    %29 = arith.maximumf %27, %28 : vector<8x30xf32>
    %c56 = arith.constant 56 : index
    %c0_12 = arith.constant 0 : index
    %30 = vector.load %arg1[%c56, %c0_12] : memref<168x128xf32, #tpu.memory_space<vmem>>, vector<30x20xf32>
    %cst_13 = arith.constant dense<0.000000e+00> : vector<8x20xf32>
    %31 = tpu.matmul %29, %30, %cst_13 {dimension_numbers = #tpu.dot_dimension_numbers<[1], [0], [0], [1], [0, 0, 1, 1], [], []>} : vector<8x30xf32>, vector<30x20xf32>, vector<8x20xf32> -> vector<8x20xf32>
    %cst_14 = arith.constant dense<0.000000e+00> : vector<20xf32>
    %32 = vector.multi_reduction <add>, %31, %cst_14 [0] : vector<8x20xf32> to vector<20xf32>
    %33 = vector.shape_cast %32 : vector<20xf32> to vector<1x20xf32>
    %cst_15 = arith.constant 1.250000e-01 : f32
    %34 = vector.broadcast %cst_15 : f32 to vector<1x20xf32>
    %35 = arith.mulf %33, %34 : vector<1x20xf32>
    %36 = arith.mulf %31, %31 : vector<8x20xf32>
    %cst_16 = arith.constant dense<0.000000e+00> : vector<20xf32>
    %37 = vector.multi_reduction <add>, %36, %cst_16 [0] : vector<8x20xf32> to vector<20xf32>
    %38 = vector.shape_cast %37 : vector<20xf32> to vector<1x20xf32>
    %cst_17 = arith.constant 1.250000e-01 : f32
    %39 = vector.broadcast %cst_17 : f32 to vector<1x20xf32>
    %40 = arith.mulf %38, %39 : vector<1x20xf32>
    %41 = arith.mulf %35, %35 : vector<1x20xf32>
    %42 = arith.subf %40, %41 : vector<1x20xf32>
    %cst_18 = arith.constant 0.000000e+00 : f32
    %43 = vector.broadcast %cst_18 : f32 to vector<1x20xf32>
    %44 = arith.maximumf %42, %43 : vector<1x20xf32>
    %c88 = arith.constant 88 : index
    %c0_19 = arith.constant 0 : index
    %45 = vector.load %arg1[%c88, %c0_19] : memref<168x128xf32, #tpu.memory_space<vmem>>, vector<1x20xf32>
    %cst_20 = arith.constant 9.99999974E-6 : f32
    %46 = vector.broadcast %cst_20 : f32 to vector<1x20xf32>
    %47 = arith.addf %44, %46 : vector<1x20xf32>
    %48 = math.rsqrt %47 : vector<1x20xf32>
    %49 = arith.mulf %45, %48 : vector<1x20xf32>
    %c96 = arith.constant 96 : index
    %c0_21 = arith.constant 0 : index
    %50 = vector.load %arg1[%c96, %c0_21] : memref<168x128xf32, #tpu.memory_space<vmem>>, vector<1x20xf32>
    %51 = arith.mulf %35, %49 : vector<1x20xf32>
    %52 = arith.subf %50, %51 : vector<1x20xf32>
    %53 = vector.broadcast %49 : vector<1x20xf32> to vector<8x20xf32>
    %54 = arith.mulf %31, %53 : vector<8x20xf32>
    %55 = vector.broadcast %52 : vector<1x20xf32> to vector<8x20xf32>
    %56 = arith.addf %54, %55 : vector<8x20xf32>
    %cst_22 = arith.constant 0.000000e+00 : f32
    %57 = vector.broadcast %cst_22 : f32 to vector<8x20xf32>
    %58 = arith.maximumf %56, %57 : vector<8x20xf32>
    %c104 = arith.constant 104 : index
    %c0_23 = arith.constant 0 : index
    %59 = vector.load %arg1[%c104, %c0_23] : memref<168x128xf32, #tpu.memory_space<vmem>>, vector<20x15xf32>
    %cst_24 = arith.constant dense<0.000000e+00> : vector<8x15xf32>
    %60 = tpu.matmul %58, %59, %cst_24 {dimension_numbers = #tpu.dot_dimension_numbers<[1], [0], [0], [1], [0, 0, 1, 1], [], []>} : vector<8x20xf32>, vector<20x15xf32>, vector<8x15xf32> -> vector<8x15xf32>
    %cst_25 = arith.constant dense<0.000000e+00> : vector<15xf32>
    %61 = vector.multi_reduction <add>, %60, %cst_25 [0] : vector<8x15xf32> to vector<15xf32>
    %62 = vector.shape_cast %61 : vector<15xf32> to vector<1x15xf32>
    %cst_26 = arith.constant 1.250000e-01 : f32
    %63 = vector.broadcast %cst_26 : f32 to vector<1x15xf32>
    %64 = arith.mulf %62, %63 : vector<1x15xf32>
    %65 = arith.mulf %60, %60 : vector<8x15xf32>
    %cst_27 = arith.constant dense<0.000000e+00> : vector<15xf32>
    %66 = vector.multi_reduction <add>, %65, %cst_27 [0] : vector<8x15xf32> to vector<15xf32>
    %67 = vector.shape_cast %66 : vector<15xf32> to vector<1x15xf32>
    %cst_28 = arith.constant 1.250000e-01 : f32
    %68 = vector.broadcast %cst_28 : f32 to vector<1x15xf32>
    %69 = arith.mulf %67, %68 : vector<1x15xf32>
    %70 = arith.mulf %64, %64 : vector<1x15xf32>
    %71 = arith.subf %69, %70 : vector<1x15xf32>
    %cst_29 = arith.constant 0.000000e+00 : f32
    %72 = vector.broadcast %cst_29 : f32 to vector<1x15xf32>
    %73 = arith.maximumf %71, %72 : vector<1x15xf32>
    %c128 = arith.constant 128 : index
    %c0_30 = arith.constant 0 : index
    %74 = vector.load %arg1[%c128, %c0_30] : memref<168x128xf32, #tpu.memory_space<vmem>>, vector<1x15xf32>
    %cst_31 = arith.constant 9.99999974E-6 : f32
    %75 = vector.broadcast %cst_31 : f32 to vector<1x15xf32>
    %76 = arith.addf %73, %75 : vector<1x15xf32>
    %77 = math.rsqrt %76 : vector<1x15xf32>
    %78 = arith.mulf %74, %77 : vector<1x15xf32>
    %c136 = arith.constant 136 : index
    %c0_32 = arith.constant 0 : index
    %79 = vector.load %arg1[%c136, %c0_32] : memref<168x128xf32, #tpu.memory_space<vmem>>, vector<1x15xf32>
    %80 = arith.mulf %64, %78 : vector<1x15xf32>
    %81 = arith.subf %79, %80 : vector<1x15xf32>
    %82 = vector.broadcast %78 : vector<1x15xf32> to vector<8x15xf32>
    %83 = arith.mulf %60, %82 : vector<8x15xf32>
    %84 = vector.broadcast %81 : vector<1x15xf32> to vector<8x15xf32>
    %85 = arith.addf %83, %84 : vector<8x15xf32>
    %cst_33 = arith.constant 0.000000e+00 : f32
    %86 = vector.broadcast %cst_33 : f32 to vector<8x15xf32>
    %87 = arith.maximumf %85, %86 : vector<8x15xf32>
    %c144 = arith.constant 144 : index
    %c0_34 = arith.constant 0 : index
    %88 = vector.load %arg1[%c144, %c0_34] : memref<168x128xf32, #tpu.memory_space<vmem>>, vector<15x10xf32>
    %cst_35 = arith.constant dense<0.000000e+00> : vector<8x10xf32>
    %89 = tpu.matmul %87, %88, %cst_35 {dimension_numbers = #tpu.dot_dimension_numbers<[1], [0], [0], [1], [0, 0, 1, 1], [], []>} : vector<8x15xf32>, vector<15x10xf32>, vector<8x10xf32> -> vector<8x10xf32>
    %c160 = arith.constant 160 : index
    %c0_36 = arith.constant 0 : index
    %90 = vector.load %arg1[%c160, %c0_36] : memref<168x128xf32, #tpu.memory_space<vmem>>, vector<1x10xf32>
    %91 = vector.broadcast %90 : vector<1x10xf32> to vector<8x10xf32>
    %92 = arith.addf %89, %91 : vector<8x10xf32>
    %c0_37 = arith.constant 0 : index
    %c0_38 = arith.constant 0 : index
    %93 = vector.load %arg2[%c0_37, %c0_38] : memref<8x10xf32, #tpu.memory_space<vmem>>, vector<8x10xf32>
    tpu.vector_store %arg2[%c0_37, %c0_38], %92 {strides = array<i32>} : memref<8x10xf32, #tpu.memory_space<vmem>>, vector<8x10xf32>,
    return
  }
}

</mosaic_0001>

<bundles_post_ra>
// kernel: tpu_custom_call.1
= control target key start
LH: loop header
LB: loop body
LE: loop exit
PB: predicated region body
PF: predicated region fallthrough
CT: control target
= control target key end

     0   :  { %7 = vsyncpa [#allocation3], 0  ;;  %s719_s0 = inlined_call_operand.hbm [shape: f32[8,38], index: 0, kind: input, shape index: {}]   ;;  %s720_s1 = inlined_call_operand.hbm [shape: f32[168,128], index: 1, kind: input, shape index: {}]   ;;  %s721_s2 = inlined_call_operand.hbm [shape: f32[8,10], index: 2, kind: output, shape index: {}]  }
   0x1   :  { %8 = vsyncpa [#allocation6], 0 }
   0x2   :  { %9 = vsyncpa [#allocation4], 0  ;;  %s647_s9 = smov [#allocation2]   ;;  %s648_s11 = smov [#allocation5]  }
   0x3   :  { %s16_s10 = sshll.u32 %s647_s9, 4  ;;  %s25_s12 = sshll.u32 %s648_s11, 4  ;;  %s17_s10 = int_to_ptr.vmem [resolvable:$true] %s16_s10  ;;  %s26_s12 = int_to_ptr.vmem [resolvable:$true] %s25_s12 }
   0x4   :  { %s589_s13 = scalar_lea.vmem %s17_s10, 128  ;;  %p594_p1 = scmp.lt.s32.totalorder %s17_s10, %s17_s10 }
   0x5   :  { %p590_p0 = scmp.ne.s32.totalorder %s17_s10, %s589_s13  ;;  %p595_p2 = scmp.lt.s32.totalorder %s589_s13, %s589_s13 }
   0x7   :  { %p596_p3 = por %p595_p2, %p594_p1 }
   0x9   :  { %p597_p4 = pnand %p596_p3, %p590_p0 }
   0xb   :  { %600 = shalt.err (!%p597_p4)
}
   0xc   :  { %19 = dma.hbm_to_vmem [thread:$0]  %s719_s0, 128, %s17_s10, [#allocation3]  }
   0xd   :  { %s609_s16 = scalar_lea.vmem %s26_s12, 2688  ;;  %p614_p6 = scmp.lt.s32.totalorder %s26_s12, %s26_s12 }
   0xe   :  { %p610_p5 = scmp.ne.s32.totalorder %s26_s12, %s609_s16  ;;  %p615_p7 = scmp.lt.s32.totalorder %s609_s16, %s609_s16 }
  0x10   :  { %p616_p8 = por %p615_p7, %p614_p6 }
  0x12   :  { %p617_p9 = pnand %p616_p8, %p610_p5 }
  0x14   :  { %620 = shalt.err (!%p617_p9)
}
  0x15   :  { %s649_s17 = smov 128   ;;  %s650_s18 = smov 8  }
  0x16   :  { %31 = dma.hbm_to_vmem [thread:$0]  %s720_s1, 2688, %s26_s12, [#allocation6], %s649_s17, %s649_s17, %s650_s18  }
  0x17   :  { %641 = dma.done.wait [#allocation3], 128  }
  0x18   :  { %642 = vsyncadd [#allocation3], 4294967168 }
  0x19   :  { %643 = dma.done.wait [#allocation6], 2688  }
  0x1a   :  { %644 = vsyncadd [#allocation6], 4294964608  ;;  %v651_v0 = vmov 0.0   ;;  %vm652_vm0 = vmmov 0   ;;  %vm48_vm1 = vcmask 1045504   ;;  %v42_v2 = vld [vmem:[#allocation5 + $0x18] sm:$0xff]  ;;  %v150_v34 = vlaneseq }
  0x1b   :  { %528 = vmatprep.subr.mxu0 %v651_v0  ;;  %538 = vmatprep.mubr.msk.f32.mxu0 %vm652_vm0, %v651_v0  ;;  %v43_v1 = vld [vmem:[#allocation5 + $0x20] sm:$0x3f]  ;;  %v41_v3 = vld [vmem:[#allocation5 + $0x10] sm:$0xff]  ;;  %v40_v4 = vld [vmem:[#allocation5 + $0x8] sm:$0xff]  ;;  %vm44_vm2 = vcmask 310272   ;;  %vm122_vm3 = vcmask 244736  }
  0x1c   :  { %541 = vmatprep.subr.mxu1 %v651_v0  ;;  %549 = vmatprep.mubr.msk.f32.mxu1 %vm652_vm0, %v651_v0  ;;  %v39_v5 = vld [vmem:[#allocation5] sm:$0xff]  ;;  %v38_v6 = vld [vmem:[#allocation2] sm:$0xff]  ;;  %v164_v7 = vld [vmem:[#allocation5 + $0x50] sm:$0x3f]  ;;  %v151_v35 = vshrl.u32 %v150_v34, 7  ;;  %vm286_vm4 = vcmask 1043456  }
  0x1d   :  { %529 = vmatpush3.msk.msra.mxu0 %vm48_vm1, %v43_v1  ;;  %542 = vmatpush3.msk.msra.mxu1 %vm48_vm1, %v164_v7  ;;  %v163_v8 = vld [vmem:[#allocation5 + $0x48] sm:$0xff]  ;;  %v162_v9 = vld [vmem:[#allocation5 + $0x40] sm:$0xff]  ;;  %v161_v10 = vld [vmem:[#allocation5 + $0x38] sm:$0xff]  ;;  %vm241_vm5 = vcmask 162816   ;;  %vm409_vm6 = vcmask 1046528   ;;  %vm360_vm7 = vcmask 121856  }
  0x1e   :  { %530 = vmatprep.subr.mxu0 %v651_v0  ;;  %543 = vmatprep.subr.mxu1 %v651_v0  ;;  %v143_v36 = vld [vmem:[#allocation5 + $0x28] sm:$0x1]  ;;  %v696_v37 = vsub.s32 0, %v151_v35  ;;  %v147_v40 = vld [vmem:[#allocation5 + $0x30] sm:$0x1]  ;;  %s653_s0 = smov [#allocation7]  }
  0x1f   :  { %531 = vmatpush3.msra.mxu0 %v42_v2  ;;  %544 = vmatpush3.msra.mxu1 %v163_v8  ;;  %v282_v48 = vld [vmem:[#allocation5 + $0x78] sm:$0xf]  ;;  %v281_v49 = vld [vmem:[#allocation5 + $0x70] sm:$0xff]  ;;  %v280_v50 = vld [vmem:[#allocation5 + $0x68] sm:$0xff]  ;;  %s491_s1 = sshll.u32 %s653_s0, 4  ;;  %vm483_vm8 = vcmask 80896   ;;  %s492_s1 = int_to_ptr.vmem [resolvable:$true] %s491_s1 }
  0x20   :  { %532 = vmatprep.subr.mxu0 %v651_v0  ;;  %545 = vmatprep.subr.mxu1 %v651_v0  ;;  %s621_s21 = scalar_lea.vmem %s492_s1, 128  ;;  %p626_p11 = scmp.lt.s32.totalorder %s492_s1, %s492_s1 }
  0x21   :  { %533 = vmatpush3.msra.mxu0 %v41_v3  ;;  %546 = vmatpush3.msra.mxu1 %v162_v9  ;;  %p622_p10 = scmp.ne.s32.totalorder %s492_s1, %s621_s21  ;;  %p627_p12 = scmp.lt.s32.totalorder %s621_s21, %s621_s21 }
  0x22   :  { %534 = vmatprep.subr.mxu0 %v651_v0  ;;  %547 = vmatprep.subr.mxu1 %v651_v0 }
  0x23   :  { %535 = vmatpush3.msra.mxu0 %v40_v4  ;;  %548 = vmatpush3.msra.mxu1 %v161_v10  ;;  %p628_p13 = por %p627_p12, %p626_p11 }
  0x24   :  { %536 = vmatprep.subr.mxu0 %v651_v0  ;;  %552 = vmatprep.subr.mxu1 %v651_v0 }
  0x25   :  { %537 = vmatpush3.msra.mxu0 %v39_v5  ;;  %p629_p0 = pnand %p628_p13, %p622_p10 }
  0x26   :  { %539 = vmatmul.mubr.msk.f32.vlgmr.msra.gmra.mxu0 %vm44_vm2, %v38_v6  ;;  %561 = vmatprep.subr.mxu0 %v651_v0 }
  0x27   :  { %565 = vmatprep.mubr.msk.f32.mxu0 %vm652_vm0, %v651_v0 }
  0xe6   :  { %v118_v11 = vpop.f32.mrf.mxu0 }
  0xe7   :  { %v123_v12 = vsel %vm122_vm3, %v118_v11, 0.0  ;;  %v131_v13 = vmul.f32 %v118_v11, %v118_v11 }
  0xe8   :  { %v124_v14 = vrot.slane %v123_v12, 4  ;;  %v540_v15 = vpop.f32.mrf.mxu0 }
  0xe9   :  { %v132_v16 = vsel %vm122_vm3, %v131_v13, 0.0 }
  0xea   :  { %v125_v17 = vadd.f32 %v124_v14, %v123_v12  ;;  %v133_v18 = vrot.slane %v132_v16, 4  ;;  %v266_v14 = vld [vmem:[#allocation5 + $0x60] sm:$0x1] }
  0xec   :  { %v126_v19 = vrot.slane %v125_v17, 2  ;;  %v134_v20 = vadd.f32 %v133_v18, %v132_v16 }
  0xee   :  { %v127_v21 = vadd.f32 %v126_v19, %v125_v17  ;;  %v135_v22 = vrot.slane %v134_v20, 2 }
  0xf0   :  { %v128_v23 = vrot.slane %v127_v21, 1  ;;  %v136_v24 = vadd.f32 %v135_v22, %v134_v20  ;;  %v400_v22 = vld [vmem:[#allocation5 + $0x98] sm:$0x7f] }
  0xf1   :  { %562 = vmatpush3.msk.msra.mxu0 %vm409_vm6, %v400_v22 }
  0xf2   :  { %v129_v25 = vadd.f32 %v128_v23, %v127_v21  ;;  %v137_v26 = vrot.slane %v136_v24, 1  ;;  %563 = vmatprep.subr.mxu0 %v651_v0  ;;  %v399_v23 = vld [vmem:[#allocation5 + $0x90] sm:$0xff] }
  0xf3   :  { %564 = vmatpush3.msra.mxu0 %v399_v23 }
  0xf4   :  { %v130_v27 = vmul.f32 0.125, %v129_v25  ;;  %v138_v28 = vadd.f32 %v137_v26, %v136_v24 }
  0xf6   :  { %v139_v29 = vmul.f32 0.125, %v138_v28  ;;  %v140_v30 = vmul.f32 %v130_v27, %v130_v27 }
  0xf8   :  { %v141_v31 = vsub.f32 %v139_v29, %v140_v30 }
  0xfa   :  { %v142_v32 = vmax.f32 %v141_v31, 0.0 }
  0xfc   :  { %v144_v33 = vadd.f32 1e-05, %v142_v32 }
  0xfe   :  { %575 = vrsqrt.f32 %v144_v33 }
 0x10b   :  { %v576_v38 = vpop.eup %575 }
 0x10c   :  { %v146_v39 = vmul.f32 %v576_v38, %v143_v36 }
 0x10e   :  { %v148_v41 = vmul.f32 %v146_v39, %v130_v27  ;;  %v153_v42 = vrot.slane %v146_v39, %v696_v37 }
 0x110   :  { %v149_v43 = vsub.f32 %v147_v40, %v148_v41  ;;  %v154_v44 = vmul.f32 %v153_v42, %v118_v11  ;;  %v262_v11 = vld [vmem:[#allocation5 + $0x58] sm:$0x1] }
 0x112   :  { %v158_v45 = vrot.slane %v149_v43, %v696_v37 }
 0x114   :  { %v159_v46 = vadd.f32 %v158_v45, %v154_v44 }
 0x116   :  { %v160_v47 = vmax.f32 %v159_v46, 0.0 }
 0x118   :  { %550 = vmatmul.mubr.msk.f32.vlgmr.msra.gmra.mxu1 %vm122_vm3, %v160_v47  ;;  %v381_v47 = vld [vmem:[#allocation5 + $0x80] sm:$0x1] }
 0x119   :  { %558 = vmatprep.mubr.msk.f32.mxu1 %vm652_vm0, %v651_v0  ;;  %553 = vmatpush3.msk.msra.mxu1 %vm286_vm4, %v282_v48 }
 0x11a   :  { %554 = vmatprep.subr.mxu1 %v651_v0 }
 0x11b   :  { %555 = vmatpush3.msra.mxu1 %v281_v49 }
 0x11c   :  { %556 = vmatprep.subr.mxu1 %v651_v0 }
 0x11d   :  { %557 = vmatpush3.msra.mxu1 %v280_v50  ;;  %v385_v50 = vld [vmem:[#allocation5 + $0x88] sm:$0x1] }
 0x1d8   :  { %v237_v51 = vpop.f32.mrf.mxu1 }
 0x1d9   :  { %v242_v52 = vsel %vm241_vm5, %v237_v51, 0.0  ;;  %v250_v53 = vmul.f32 %v237_v51, %v237_v51 }
 0x1da   :  { %v243_v54 = vrot.slane %v242_v52, 4  ;;  %v551_v55 = vpop.f32.mrf.mxu1 }
 0x1db   :  { %v251_v56 = vsel %vm241_vm5, %v250_v53, 0.0 }
 0x1dc   :  { %v244_v57 = vadd.f32 %v243_v54, %v242_v52  ;;  %v252_v58 = vrot.slane %v251_v56, 4 }
 0x1de   :  { %v245_v59 = vrot.slane %v244_v57, 2  ;;  %v253_v60 = vadd.f32 %v252_v58, %v251_v56  ;;  %v507_v58 = vld [vmem:[#allocation5 + $0xa0] ss:$0 sm:$0xff] }
 0x1e0   :  { %v246_v61 = vadd.f32 %v245_v59, %v244_v57  ;;  %v254_v62 = vrot.slane %v253_v60, 2 }
 0x1e2   :  { %v247_v63 = vrot.slane %v246_v61, 1  ;;  %v255_v1 = vadd.f32 %v254_v62, %v253_v60 }
 0x1e4   :  { %v248_v2 = vadd.f32 %v247_v63, %v246_v61  ;;  %v256_v3 = vrot.slane %v255_v1, 1 }
 0x1e6   :  { %v249_v4 = vmul.f32 0.125, %v248_v2  ;;  %v257_v5 = vadd.f32 %v256_v3, %v255_v1 }
 0x1e8   :  { %v258_v6 = vmul.f32 0.125, %v257_v5  ;;  %v259_v7 = vmul.f32 %v249_v4, %v249_v4 }
 0x1ea   :  { %v260_v8 = vsub.f32 %v258_v6, %v259_v7 }
 0x1ec   :  { %v261_v9 = vmax.f32 %v260_v8, 0.0 }
 0x1ee   :  { %v263_v10 = vadd.f32 1e-05, %v261_v9 }
 0x1f0   :  { %577 = vrsqrt.f32 %v263_v10 }
 0x1fd   :  { %v578_v12 = vpop.eup %577 }
 0x1fe   :  { %v265_v13 = vmul.f32 %v578_v12, %v262_v11 }
 0x200   :  { %v267_v15 = vmul.f32 %v265_v13, %v249_v4  ;;  %v272_v16 = vrot.slane %v265_v13, %v696_v37 }
 0x202   :  { %v268_v17 = vsub.f32 %v266_v14, %v267_v15  ;;  %v273_v18 = vmul.f32 %v272_v16, %v237_v51 }
 0x204   :  { %v277_v19 = vrot.slane %v268_v17, %v696_v37 }
 0x206   :  { %v278_v20 = vadd.f32 %v277_v19, %v273_v18 }
 0x208   :  { %v279_v21 = vmax.f32 %v278_v20, 0.0 }
 0x20a   :  { %559 = vmatmul.mubr.msk.f32.vlgmr.msra.gmra.mxu1 %vm241_vm5, %v279_v21 }
 0x2ca   :  { %v356_v24 = vpop.f32.mrf.mxu1 }
 0x2cb   :  { %v361_v25 = vsel %vm360_vm7, %v356_v24, 0.0  ;;  %v369_v26 = vmul.f32 %v356_v24, %v356_v24 }
 0x2cc   :  { %v362_v27 = vrot.slane %v361_v25, 4  ;;  %v560_v28 = vpop.f32.mrf.mxu1 }
 0x2cd   :  { %v370_v29 = vsel %vm360_vm7, %v369_v26, 0.0 }
 0x2ce   :  { %v363_v30 = vadd.f32 %v362_v27, %v361_v25  ;;  %v371_v31 = vrot.slane %v370_v29, 4 }
 0x2d0   :  { %v364_v32 = vrot.slane %v363_v30, 2  ;;  %v372_v33 = vadd.f32 %v371_v31, %v370_v29 }
 0x2d2   :  { %v365_v34 = vadd.f32 %v364_v32, %v363_v30  ;;  %v373_v35 = vrot.slane %v372_v33, 2 }
 0x2d4   :  { %v366_v36 = vrot.slane %v365_v34, 1  ;;  %v374_v38 = vadd.f32 %v373_v35, %v372_v33 }
 0x2d6   :  { %v367_v0 = vadd.f32 %v366_v36, %v365_v34  ;;  %v375_v39 = vrot.slane %v374_v38, 1 }
 0x2d8   :  { %v368_v40 = vmul.f32 0.125, %v367_v0  ;;  %v376_v41 = vadd.f32 %v375_v39, %v374_v38 }
 0x2da   :  { %v377_v42 = vmul.f32 0.125, %v376_v41  ;;  %v378_v43 = vmul.f32 %v368_v40, %v368_v40 }
 0x2dc   :  { %v379_v44 = vsub.f32 %v377_v42, %v378_v43 }
 0x2de   :  { %v380_v45 = vmax.f32 %v379_v44, 0.0 }
 0x2e0   :  { %v382_v46 = vadd.f32 1e-05, %v380_v45 }
 0x2e2   :  { %579 = vrsqrt.f32 %v382_v46 }
 0x2ef   :  { %v580_v48 = vpop.eup %579 }
 0x2f0   :  { %v384_v49 = vmul.f32 %v580_v48, %v381_v47 }
 0x2f2   :  { %v386_v51 = vmul.f32 %v384_v49, %v368_v40  ;;  %v391_v52 = vrot.slane %v384_v49, %v696_v37 }
 0x2f4   :  { %v387_v53 = vsub.f32 %v385_v50, %v386_v51  ;;  %v392_v54 = vmul.f32 %v391_v52, %v356_v24 }
 0x2f6   :  { %v396_v55 = vrot.slane %v387_v53, %v696_v37 }
 0x2f8   :  { %v397_v56 = vadd.f32 %v396_v55, %v392_v54 }
 0x2fa   :  { %v398_v57 = vmax.f32 %v397_v56, 0.0 }
 0x2fc   :  { %566 = vmatmul.mubr.msk.f32.vlgmr.msra.gmra.mxu0 %vm360_vm7, %v398_v57 }
 0x3bc   :  { %v479_v59 = vpop.f32.mrf.mxu0 }
 0x3bd   :  { %v480_v60 = vadd.f32 %v507_v58, %v479_v59 }
 0x3be   :  { %v567_v61 = vpop.f32.mrf.mxu0 }
 0x3bf   :  { %484 = vst.msk [vmem:[#allocation7] sm:$0xff] %vm483_vm8, %v480_v60 }
 0x3c0   :  { %632 = shalt.err (!%p629_p0)
}
 0x3c1   :  { %494 = dma.vmem_to_hbm [thread:$0]  %s492_s1, 128, %s721_s2, [#allocation4]  }
 0x3c2   :  { %645 = dma.done.wait [#allocation4], 128  }
 0x3c3   :  { %646 = vsyncadd [#allocation4], 4294967168 }
 0x3c4   :  { %498 = vsyncpa [#allocation3], 1 }
 0x3c5   :  { %499 = vsyncpa [#allocation6], 1 }
 0x3c6   :  { %500 = vsyncpa [#allocation4], 1 }

</bundles_post_ra>
